<compile_context>
chip_gen: v6e
topology: v6e:2x2x1
jax: 0.10.0
libtpu: 0.0.40
codegen_flags: <defaults>
</compile_context>

<pallas_src>
import functools

import jax
import jax.numpy as jnp
from jax.experimental import pallas as pl
from jax.experimental.pallas import tpu as pltpu


def _round_up(x, m):
    return ((x + m - 1) // m) * m


def _cdiv(a, b):
    return (a + b - 1) // b


def _vmem_budget_bytes():
    """Per-generation VMEM budget (v5e/v6e: ~96 MiB, v7x: ~48 MiB)."""
    phys = 64 * 1024 * 1024                 # conservative default (v7x-sized)
    try:
        phys = int(pltpu.get_tpu_info().vmem_capacity_bytes)
    except Exception:
        pass
    return int(min(phys * 3 // 4, 100 * 1024 * 1024))


def _pick_node_tile(num_nodes, seq_len, emb_dim, vocab, table_itemsize,
                    out_itemsize, use_onehot, tile_budget_bytes, max_node_tile):
    """Largest node tile that fits the explicit VMEM budget, with >=4 grid steps."""
    # >= 4 grid steps when possible: shards across v7x TensorCores and lets the
    # output writeback pipeline overlap compute.
    cap = max(8, _round_up(_cdiv(num_nodes, 4), 8))
    tile = max(8, min(_round_up(max_node_tile, 8), cap))
    if not use_onehot:
        tile = min(tile, 256)               # bound outstanding row DMAs per step
    ids_lanes = _round_up(max(seq_len, 1), 128)   # int32 ids tile pads lanes to 128
    while True:
        lens_b = tile * 128 * 4 * 2                        # (tile,1) i32, lane-padded, 2 bufs
        out_b = tile * emb_dim * out_itemsize * 2          # output tile, 2 bufs
        if use_onehot:
            ids_b = tile * ids_lanes * 4 * 2
            table_b = vocab * emb_dim * table_itemsize * 2   # grid-invariant but double-buffered
            interm = 3 * tile * vocab * 4 + tile * emb_dim * 4
        else:
            ids_b = 0                                       # ids live in SMEM (scalar prefetch)
            table_b = 0                                     # table stays in HBM (pl.ANY)
            interm = (tile * _round_up(max(seq_len, 1), 8) * emb_dim * table_itemsize
                      + 3 * tile * emb_dim * 4)
        if lens_b + out_b + ids_b + table_b + interm <= tile_budget_bytes or tile <= 8:
            return tile
        tile = max(8, _round_up(tile // 2, 8))


def _onehot_pool_kernel(ids_ref, lens_ref, table_ref, out_ref, *, approx_reciprocal):
    """Tiny-vocab path: pooled = (one-hot token counts) @ table on the MXU.

    ids_ref   : (tile, L) int32
    lens_ref  : (tile, 1) int32
    table_ref : (V, D)    table dtype (VMEM resident, V <= ~256)
    out_ref   : (tile, D) out dtype
    """
    node_tile, seq_len = ids_ref.shape
    vocab = table_ref.shape[0]

    ids = ids_ref[...]                                       # (tile, L) int32
    lens = lens_ref[...]                                     # (tile, 1) int32
    viota = jax.lax.broadcasted_iota(jnp.int32, (1, vocab), 1)
    piota = jax.lax.broadcasted_iota(jnp.int32, (1, seq_len), 1)

    def body(l, counts):
        # Extract column l with a lane-reduce (no dynamic lane slicing needed).
        tok = jnp.sum(jnp.where(piota == l, ids, 0), axis=1, keepdims=True)   # (tile, 1)
        hit = jnp.where(lens > l, (tok == viota).astype(jnp.float32), 0.0)    # (tile, V)
        return counts + hit

    # fori_loop bounds live ranges to ~2 (tile, V) values (vs. L with a Python
    # unroll); partial unroll keeps LLO scheduler visibility.
    counts = jax.lax.fori_loop(0, seq_len, body,
                               jnp.zeros((node_tile, vocab), jnp.float32),
                               unroll=min(seq_len, 8))

    # Counts are integers <= seq_len: exact in bf16 only while seq_len <= 256.
    if table_ref.dtype == jnp.bfloat16 and seq_len <= 256:
        lhs = counts.astype(jnp.bfloat16)
    else:
        lhs = counts
    pooled = jnp.dot(lhs, table_ref[...], preferred_element_type=jnp.float32)

    denom = jnp.maximum(lens, 1).astype(jnp.float32)          # len 0 -> zero row
    inv = pl.reciprocal(denom, approx=True) if approx_reciprocal else 1.0 / denom
    out_ref[...] = (pooled * inv).astype(out_ref.dtype)


def _gather_pool_kernel(ids_sm_ref, lens_ref, table_ref, out_ref,
                        gbuf_ref, sem_ref, *, approx_reciprocal):
    """General-vocab path: DMA one table row per (node, token) out of HBM.

    ids_sm_ref : (padded_n * L,) int32 in SMEM (scalar prefetched)
    lens_ref   : (tile, 1) int32 VMEM
    table_ref  : (V, D) table dtype, memory_space=pl.ANY (HBM)
    out_ref    : (tile, D) out dtype
    gbuf_ref   : (tile, L, D) VMEM scratch (table dtype)
    sem_ref    : DMA semaphore (1,)
    """
    node_tile, seq_len, emb_dim = gbuf_ref.shape
    n_rows = node_tile * seq_len
    base = pl.program_id(0) * n_rows

    # Issue one row DMA per (node, token).  Ids were clamped to [0, vocab) in
    # the wrapper so every DMA is in bounds; invalid positions are masked below.
    @pl.loop(0, node_tile)
    def _issue_node(n):
        row_base = base + n * seq_len

        @pl.loop(0, seq_len)
        def _issue_tok(l):
            tok = ids_sm_ref[row_base + l]
            pltpu.make_async_copy(table_ref.at[tok], gbuf_ref.at[n, l],
                                  sem_ref.at[0]).start()

    # Wait for all row DMAs (reconstruct a same-sized descriptor per copy).
    @pl.loop(0, n_rows)
    def _wait_row(_):
        pltpu.make_async_copy(table_ref.at[0], gbuf_ref.at[0, 0],
                              sem_ref.at[0]).wait()

    lens = lens_ref[...]                                      # (tile, 1) int32
    acc = jnp.zeros((node_tile, emb_dim), jnp.float32)
    for l in range(seq_len):   # static + small; temporaries are only (tile, D)
        valid = (lens > l).astype(jnp.float32)                # (tile, 1)
        acc = acc + gbuf_ref[:, l, :].astype(jnp.float32) * valid

    denom = jnp.maximum(lens, 1).astype(jnp.float32)          # len 0 -> zero row
    inv = pl.reciprocal(denom, approx=True) if approx_reciprocal else 1.0 / denom
    out_ref[...] = (acc * inv).astype(out_ref.dtype)


def embedding_construction_forward(token_ids, lengths, emb_table, *,
                                   out_dtype=jnp.float32,
                                   onehot_max_vocab=256,
                                   approx_reciprocal=True,
                                   max_node_tile=1024):
    """Fused word-embedding lookup + masked mean pooling over node tokens.

    token_ids : (num_nodes, seq_len) int   token ids per node (padding arbitrary)
    lengths   : (num_nodes,)         int   number of valid tokens per node
    emb_table : (vocab, emb_dim)           embedding weights (bf16 recommended)
    returns   : (num_nodes, emb_dim) out_dtype
    """
    num_nodes, seq_len = token_ids.shape
    vocab, emb_dim = emb_table.shape
    assert emb_dim % 128 == 0, "pad emb_dim to a multiple of 128 (lane-dense stores)"

    table_itemsize = jnp.dtype(emb_table.dtype).itemsize
    out_itemsize = jnp.dtype(out_dtype).itemsize

    vmem_limit = _vmem_budget_bytes()
    tile_budget = vmem_limit - 8 * 1024 * 1024            # headroom for compiler temps

    use_onehot = (vocab <= onehot_max_vocab
                  and vocab * emb_dim * table_itemsize * 2 <= tile_budget // 2)

    node_tile = _pick_node_tile(num_nodes, seq_len, emb_dim, vocab,
                                table_itemsize, out_itemsize, use_onehot,
                                tile_budget, max_node_tile)
    padded_n = _round_up(num_nodes, node_tile)
    grid = (padded_n // node_tile,)

    # Clamp ids so the DMA-gather path never reads out of bounds (the PyTorch
    # gather would raise on such ids); pad extra rows with id 0 / length 0.
    # Padded nodes and nodes with length 0 produce all-zero embeddings.
    ids = jnp.clip(token_ids.astype(jnp.int32), 0, vocab - 1)
    lens = lengths.astype(jnp.int32)
    if padded_n != num_nodes:
        pad = padded_n - num_nodes
        ids = jnp.pad(ids, ((0, pad), (0, 0)))
        lens = jnp.pad(lens, ((0, pad),))
    # NOTE: the (tile, 1) int32 lens tile pads to 128 lanes in VMEM; the waste
    # is < 64 KiB per buffer at tile=128 and not worth an extra transpose.
    lens2d = lens[:, None]

    compiler_params = pltpu.CompilerParams(
        dimension_semantics=("parallel",),   # shard node tiles across TCs (v7x)
        vmem_limit_bytes=vmem_limit,
    )

    if use_onehot:
        kernel = functools.partial(_onehot_pool_kernel,
                                   approx_reciprocal=approx_reciprocal)
        cost = pl.CostEstimate(
            flops=int(2 * padded_n * vocab * emb_dim
                      + 4 * padded_n * seq_len * vocab),
            transcendentals=int(padded_n),
            bytes_accessed=int(padded_n * (seq_len + 1) * 4
                               + vocab * emb_dim * table_itemsize
                               + padded_n * emb_dim * out_itemsize))
        out = pl.pallas_call(
            kernel,
            out_shape=jax.ShapeDtypeStruct((padded_n, emb_dim), out_dtype),
            grid_spec=pltpu.PrefetchScalarGridSpec(
                num_scalar_prefetch=0,
                grid=grid,
                in_specs=[
                    pl.BlockSpec((node_tile, seq_len), lambda i: (i, 0)),
                    pl.BlockSpec((node_tile, 1), lambda i: (i, 0)),
                    # Grid-invariant full table; vocab is capped at ~256 rows on
                    # this path, so even default double-buffering costs at most a
                    # few hundred KiB of VMEM (large vocabs never enter VMEM at
                    # all -- they take the DMA-gather path below).
                    pl.BlockSpec((vocab, emb_dim), lambda i: (0, 0)),
                ],
                out_specs=pl.BlockSpec((node_tile, emb_dim), lambda i: (i, 0)),
            ),
            compiler_params=compiler_params,
            cost_estimate=cost,
        )(ids, lens2d, emb_table)
    else:
        ids_flat = ids.reshape(-1)
        # TODO(synk): chunk the call over the node axis when the flattened ids
        # no longer fit in SMEM.
        assert padded_n * seq_len * 4 <= 512 * 1024, (
            "flattened token ids must fit in SMEM; chunk num_nodes at the caller")
        kernel = functools.partial(_gather_pool_kernel,
                                   approx_reciprocal=approx_reciprocal)
        cost = pl.CostEstimate(
            flops=int(2 * padded_n * seq_len * emb_dim),
            transcendentals=int(padded_n),
            bytes_accessed=int(padded_n * seq_len * (4 + emb_dim * table_itemsize)
                               + padded_n * (emb_dim * out_itemsize + 4)))
        out = pl.pallas_call(
            kernel,
            out_shape=jax.ShapeDtypeStruct((padded_n, emb_dim), out_dtype),
            grid_spec=pltpu.PrefetchScalarGridSpec(
                num_scalar_prefetch=1,                     # token ids -> SMEM
                grid=grid,
                in_specs=[
                    pl.BlockSpec((node_tile, 1), lambda i, ids_sm: (i, 0)),
                    pl.BlockSpec(memory_space=pl.ANY),     # table stays in HBM
                ],
                out_specs=pl.BlockSpec((node_tile, emb_dim),
                                       lambda i, ids_sm: (i, 0)),
                scratch_shapes=[
                    pltpu.VMEM((node_tile, seq_len, emb_dim), emb_table.dtype),
                    pltpu.SemaphoreType.DMA((1,)),
                ],
            ),
            compiler_params=compiler_params,
            cost_estimate=cost,
        )(ids_flat, lens2d, emb_table)

    return out[:num_nodes]


if __name__ == "__main__":
    num_nodes, seq_len, emb_dim = 16, 8, 128
    key = jax.random.PRNGKey(0)

    # vocab=32 exercises the small-vocab one-hot MXU path,
    # vocab=512 exercises the general DMA row-gather path.
    for vocab in (32, 512):
        key, k_emb, k_ids, k_len = jax.random.split(key, 4)
        # bf16 weights: the kernel streams the table in the dtype it is given.
        emb_table = (0.02 * jax.random.normal(
            k_emb, (vocab, emb_dim), dtype=jnp.float32)).astype(jnp.bfloat16)
        token_ids = jax.random.randint(k_ids, (num_nodes, seq_len), 0, vocab,
                                       dtype=jnp.int32)
        lengths = jax.random.randint(k_len, (num_nodes,), 1, seq_len + 1,
                                     dtype=jnp.int32)

        out = embedding_construction_forward(token_ids, lengths, emb_table)
        out = jax.block_until_ready(out)

        # Pure-JAX reference (same bf16-rounded weights, f32 math).
        table_f32 = emb_table.astype(jnp.float32)
        tok_emb = jnp.take(table_f32, token_ids, axis=0)              # (N, L, D)
        mask = (jnp.arange(seq_len)[None, :] < lengths[:, None]).astype(jnp.float32)
        ref = (tok_emb * mask[:, :, None]).sum(axis=1) / jnp.maximum(
            lengths, 1).astype(jnp.float32)[:, None]

        assert out.shape == (num_nodes, emb_dim)
        # approx=True reciprocal (EUP vrcp) relaxes accuracy to ~1e-3 relative.
        assert jnp.allclose(out, ref, rtol=5e-3, atol=1e-5), f"mismatch (vocab={vocab})"

    print("KERNEL_OK")
</pallas_src>

<mosaic_0001>
module attributes {stable_mosaic.version = 11 : i64} {
  func.func @_onehot_pool_kernel(%arg0: i32, %arg1: memref<8x8xi32, #tpu.memory_space<vmem>>, %arg2: memref<8x1xi32, #tpu.memory_space<vmem>>, %arg3: memref<32x128xbf16, #tpu.memory_space<vmem>>, %arg4: memref<8x128xf32, #tpu.memory_space<vmem>>) attributes {dimension_semantics = [#tpu.dimension_semantics<parallel>], iteration_bounds = array<i64: 2>, scalar_prefetch = 0 : i64, scratch_operands = 0 : i64, tpu.core_type = #tpu.core_type<tc>, window_params = [{transform_indices = @transform_0, window_bounds = array<i64: 8, 8>}, {transform_indices = @transform_1, window_bounds = array<i64: 8, 1>}, {pipeline_mode = #tpu.pipeline_mode<synchronous>, transform_indices = @transform_2, window_bounds = array<i64: 32, 128>}, {transform_indices = @transform_3, window_bounds = array<i64: 8, 128>}]} {
    %c0 = arith.constant 0 : index
    %c0_0 = arith.constant 0 : index
    %0 = vector.load %arg1[%c0, %c0_0] : memref<8x8xi32, #tpu.memory_space<vmem>>, vector<8x8xi32>
    %c0_1 = arith.constant 0 : index
    %c0_2 = arith.constant 0 : index
    %1 = vector.load %arg2[%c0_1, %c0_2] : memref<8x1xi32, #tpu.memory_space<vmem>>, vector<8x1xi32>
    %2 = tpu.iota {dimensions = array<i32: 1>} : vector<1x32xi32>
    %3 = tpu.iota {dimensions = array<i32: 1>} : vector<1x8xi32>
    %cst = arith.constant 0.000000e+00 : f32
    %4 = vector.broadcast %cst : f32 to vector<8x32xf32>
    %c0_i32 = arith.constant 0 : i32
    %5 = vector.broadcast %c0_i32 : i32 to vector<1x8xi32>
    %6 = arith.cmpi eq, %3, %5 : vector<1x8xi32>
    %c0_i32_3 = arith.constant 0 : i32
    %7 = vector.shape_cast %6 : vector<1x8xi1> to vector<1x8xi1>
    %8 = vector.broadcast %7 : vector<1x8xi1> to vector<8x8xi1>
    %9 = vector.broadcast %c0_i32_3 : i32 to vector<8x8xi32>
    %10 = arith.select %8, %0, %9 : vector<8x8xi1>, vector<8x8xi32>
    %cst_4 = arith.constant dense<0> : vector<8xi32>
    %11 = vector.multi_reduction <add>, %10, %cst_4 [1] : vector<8x8xi32> to vector<8xi32>
    %12 = vector.shape_cast %11 : vector<8xi32> to vector<8x1xi32>
    %13 = vector.broadcast %c0_i32 : i32 to vector<8x1xi32>
    %14 = arith.cmpi sgt, %1, %13 : vector<8x1xi32>
    %15 = vector.broadcast %12 : vector<8x1xi32> to vector<8x32xi32>
    %16 = vector.broadcast %2 : vector<1x32xi32> to vector<8x32xi32>
    %17 = arith.cmpi eq, %15, %16 : vector<8x32xi32>
    %18 = arith.extui %17 : vector<8x32xi1> to vector<8x32xi32>
    %19 = arith.sitofp %18 : vector<8x32xi32> to vector<8x32xf32>
    %cst_5 = arith.constant 0.000000e+00 : f32
    %20 = vector.shape_cast %14 : vector<8x1xi1> to vector<8x1xi1>
    %21 = vector.broadcast %20 : vector<8x1xi1> to vector<8x32xi1>
    %22 = vector.broadcast %cst_5 : f32 to vector<8x32xf32>
    %23 = arith.select %21, %19, %22 : vector<8x32xi1>, vector<8x32xf32>
    %24 = arith.addf %4, %23 : vector<8x32xf32>
    %c1_i32 = arith.constant 1 : i32
    %25 = vector.broadcast %c1_i32 : i32 to vector<1x8xi32>
    %26 = arith.cmpi eq, %3, %25 : vector<1x8xi32>
    %c0_i32_6 = arith.constant 0 : i32
    %27 = vector.shape_cast %26 : vector<1x8xi1> to vector<1x8xi1>
    %28 = vector.broadcast %27 : vector<1x8xi1> to vector<8x8xi1>
    %29 = vector.broadcast %c0_i32_6 : i32 to vector<8x8xi32>
    %30 = arith.select %28, %0, %29 : vector<8x8xi1>, vector<8x8xi32>
    %cst_7 = arith.constant dense<0> : vector<8xi32>
    %31 = vector.multi_reduction <add>, %30, %cst_7 [1] : vector<8x8xi32> to vector<8xi32>
    %32 = vector.shape_cast %31 : vector<8xi32> to vector<8x1xi32>
    %33 = vector.broadcast %c1_i32 : i32 to vector<8x1xi32>
    %34 = arith.cmpi sgt, %1, %33 : vector<8x1xi32>
    %35 = vector.broadcast %32 : vector<8x1xi32> to vector<8x32xi32>
    %36 = vector.broadcast %2 : vector<1x32xi32> to vector<8x32xi32>
    %37 = arith.cmpi eq, %35, %36 : vector<8x32xi32>
    %38 = arith.extui %37 : vector<8x32xi1> to vector<8x32xi32>
    %39 = arith.sitofp %38 : vector<8x32xi32> to vector<8x32xf32>
    %cst_8 = arith.constant 0.000000e+00 : f32
    %40 = vector.shape_cast %34 : vector<8x1xi1> to vector<8x1xi1>
    %41 = vector.broadcast %40 : vector<8x1xi1> to vector<8x32xi1>
    %42 = vector.broadcast %cst_8 : f32 to vector<8x32xf32>
    %43 = arith.select %41, %39, %42 : vector<8x32xi1>, vector<8x32xf32>
    %44 = arith.addf %24, %43 : vector<8x32xf32>
    %c2_i32 = arith.constant 2 : i32
    %45 = vector.broadcast %c2_i32 : i32 to vector<1x8xi32>
    %46 = arith.cmpi eq, %3, %45 : vector<1x8xi32>
    %c0_i32_9 = arith.constant 0 : i32
    %47 = vector.shape_cast %46 : vector<1x8xi1> to vector<1x8xi1>
    %48 = vector.broadcast %47 : vector<1x8xi1> to vector<8x8xi1>
    %49 = vector.broadcast %c0_i32_9 : i32 to vector<8x8xi32>
    %50 = arith.select %48, %0, %49 : vector<8x8xi1>, vector<8x8xi32>
    %cst_10 = arith.constant dense<0> : vector<8xi32>
    %51 = vector.multi_reduction <add>, %50, %cst_10 [1] : vector<8x8xi32> to vector<8xi32>
    %52 = vector.shape_cast %51 : vector<8xi32> to vector<8x1xi32>
    %53 = vector.broadcast %c2_i32 : i32 to vector<8x1xi32>
    %54 = arith.cmpi sgt, %1, %53 : vector<8x1xi32>
    %55 = vector.broadcast %52 : vector<8x1xi32> to vector<8x32xi32>
    %56 = vector.broadcast %2 : vector<1x32xi32> to vector<8x32xi32>
    %57 = arith.cmpi eq, %55, %56 : vector<8x32xi32>
    %58 = arith.extui %57 : vector<8x32xi1> to vector<8x32xi32>
    %59 = arith.sitofp %58 : vector<8x32xi32> to vector<8x32xf32>
    %cst_11 = arith.constant 0.000000e+00 : f32
    %60 = vector.shape_cast %54 : vector<8x1xi1> to vector<8x1xi1>
    %61 = vector.broadcast %60 : vector<8x1xi1> to vector<8x32xi1>
    %62 = vector.broadcast %cst_11 : f32 to vector<8x32xf32>
    %63 = arith.select %61, %59, %62 : vector<8x32xi1>, vector<8x32xf32>
    %64 = arith.addf %44, %63 : vector<8x32xf32>
    %c3_i32 = arith.constant 3 : i32
    %65 = vector.broadcast %c3_i32 : i32 to vector<1x8xi32>
    %66 = arith.cmpi eq, %3, %65 : vector<1x8xi32>
    %c0_i32_12 = arith.constant 0 : i32
    %67 = vector.shape_cast %66 : vector<1x8xi1> to vector<1x8xi1>
    %68 = vector.broadcast %67 : vector<1x8xi1> to vector<8x8xi1>
    %69 = vector.broadcast %c0_i32_12 : i32 to vector<8x8xi32>
    %70 = arith.select %68, %0, %69 : vector<8x8xi1>, vector<8x8xi32>
    %cst_13 = arith.constant dense<0> : vector<8xi32>
    %71 = vector.multi_reduction <add>, %70, %cst_13 [1] : vector<8x8xi32> to vector<8xi32>
    %72 = vector.shape_cast %71 : vector<8xi32> to vector<8x1xi32>
    %73 = vector.broadcast %c3_i32 : i32 to vector<8x1xi32>
    %74 = arith.cmpi sgt, %1, %73 : vector<8x1xi32>
    %75 = vector.broadcast %72 : vector<8x1xi32> to vector<8x32xi32>
    %76 = vector.broadcast %2 : vector<1x32xi32> to vector<8x32xi32>
    %77 = arith.cmpi eq, %75, %76 : vector<8x32xi32>
    %78 = arith.extui %77 : vector<8x32xi1> to vector<8x32xi32>
    %79 = arith.sitofp %78 : vector<8x32xi32> to vector<8x32xf32>
    %cst_14 = arith.constant 0.000000e+00 : f32
    %80 = vector.shape_cast %74 : vector<8x1xi1> to vector<8x1xi1>
    %81 = vector.broadcast %80 : vector<8x1xi1> to vector<8x32xi1>
    %82 = vector.broadcast %cst_14 : f32 to vector<8x32xf32>
    %83 = arith.select %81, %79, %82 : vector<8x32xi1>, vector<8x32xf32>
    %84 = arith.addf %64, %83 : vector<8x32xf32>
    %c4_i32 = arith.constant 4 : i32
    %85 = vector.broadcast %c4_i32 : i32 to vector<1x8xi32>
    %86 = arith.cmpi eq, %3, %85 : vector<1x8xi32>
    %c0_i32_15 = arith.constant 0 : i32
    %87 = vector.shape_cast %86 : vector<1x8xi1> to vector<1x8xi1>
    %88 = vector.broadcast %87 : vector<1x8xi1> to vector<8x8xi1>
    %89 = vector.broadcast %c0_i32_15 : i32 to vector<8x8xi32>
    %90 = arith.select %88, %0, %89 : vector<8x8xi1>, vector<8x8xi32>
    %cst_16 = arith.constant dense<0> : vector<8xi32>
    %91 = vector.multi_reduction <add>, %90, %cst_16 [1] : vector<8x8xi32> to vector<8xi32>
    %92 = vector.shape_cast %91 : vector<8xi32> to vector<8x1xi32>
    %93 = vector.broadcast %c4_i32 : i32 to vector<8x1xi32>
    %94 = arith.cmpi sgt, %1, %93 : vector<8x1xi32>
    %95 = vector.broadcast %92 : vector<8x1xi32> to vector<8x32xi32>
    %96 = vector.broadcast %2 : vector<1x32xi32> to vector<8x32xi32>
    %97 = arith.cmpi eq, %95, %96 : vector<8x32xi32>
    %98 = arith.extui %97 : vector<8x32xi1> to vector<8x32xi32>
    %99 = arith.sitofp %98 : vector<8x32xi32> to vector<8x32xf32>
    %cst_17 = arith.constant 0.000000e+00 : f32
    %100 = vector.shape_cast %94 : vector<8x1xi1> to vector<8x1xi1>
    %101 = vector.broadcast %100 : vector<8x1xi1> to vector<8x32xi1>
    %102 = vector.broadcast %cst_17 : f32 to vector<8x32xf32>
    %103 = arith.select %101, %99, %102 : vector<8x32xi1>, vector<8x32xf32>
    %104 = arith.addf %84, %103 : vector<8x32xf32>
    %c5_i32 = arith.constant 5 : i32
    %105 = vector.broadcast %c5_i32 : i32 to vector<1x8xi32>
    %106 = arith.cmpi eq, %3, %105 : vector<1x8xi32>
    %c0_i32_18 = arith.constant 0 : i32
    %107 = vector.shape_cast %106 : vector<1x8xi1> to vector<1x8xi1>
    %108 = vector.broadcast %107 : vector<1x8xi1> to vector<8x8xi1>
    %109 = vector.broadcast %c0_i32_18 : i32 to vector<8x8xi32>
    %110 = arith.select %108, %0, %109 : vector<8x8xi1>, vector<8x8xi32>
    %cst_19 = arith.constant dense<0> : vector<8xi32>
    %111 = vector.multi_reduction <add>, %110, %cst_19 [1] : vector<8x8xi32> to vector<8xi32>
    %112 = vector.shape_cast %111 : vector<8xi32> to vector<8x1xi32>
    %113 = vector.broadcast %c5_i32 : i32 to vector<8x1xi32>
    %114 = arith.cmpi sgt, %1, %113 : vector<8x1xi32>
    %115 = vector.broadcast %112 : vector<8x1xi32> to vector<8x32xi32>
    %116 = vector.broadcast %2 : vector<1x32xi32> to vector<8x32xi32>
    %117 = arith.cmpi eq, %115, %116 : vector<8x32xi32>
    %118 = arith.extui %117 : vector<8x32xi1> to vector<8x32xi32>
    %119 = arith.sitofp %118 : vector<8x32xi32> to vector<8x32xf32>
    %cst_20 = arith.constant 0.000000e+00 : f32
    %120 = vector.shape_cast %114 : vector<8x1xi1> to vector<8x1xi1>
    %121 = vector.broadcast %120 : vector<8x1xi1> to vector<8x32xi1>
    %122 = vector.broadcast %cst_20 : f32 to vector<8x32xf32>
    %123 = arith.select %121, %119, %122 : vector<8x32xi1>, vector<8x32xf32>
    %124 = arith.addf %104, %123 : vector<8x32xf32>
    %c6_i32 = arith.constant 6 : i32
    %125 = vector.broadcast %c6_i32 : i32 to vector<1x8xi32>
    %126 = arith.cmpi eq, %3, %125 : vector<1x8xi32>
    %c0_i32_21 = arith.constant 0 : i32
    %127 = vector.shape_cast %126 : vector<1x8xi1> to vector<1x8xi1>
    %128 = vector.broadcast %127 : vector<1x8xi1> to vector<8x8xi1>
    %129 = vector.broadcast %c0_i32_21 : i32 to vector<8x8xi32>
    %130 = arith.select %128, %0, %129 : vector<8x8xi1>, vector<8x8xi32>
    %cst_22 = arith.constant dense<0> : vector<8xi32>
    %131 = vector.multi_reduction <add>, %130, %cst_22 [1] : vector<8x8xi32> to vector<8xi32>
    %132 = vector.shape_cast %131 : vector<8xi32> to vector<8x1xi32>
    %133 = vector.broadcast %c6_i32 : i32 to vector<8x1xi32>
    %134 = arith.cmpi sgt, %1, %133 : vector<8x1xi32>
    %135 = vector.broadcast %132 : vector<8x1xi32> to vector<8x32xi32>
    %136 = vector.broadcast %2 : vector<1x32xi32> to vector<8x32xi32>
    %137 = arith.cmpi eq, %135, %136 : vector<8x32xi32>
    %138 = arith.extui %137 : vector<8x32xi1> to vector<8x32xi32>
    %139 = arith.sitofp %138 : vector<8x32xi32> to vector<8x32xf32>
    %cst_23 = arith.constant 0.000000e+00 : f32
    %140 = vector.shape_cast %134 : vector<8x1xi1> to vector<8x1xi1>
    %141 = vector.broadcast %140 : vector<8x1xi1> to vector<8x32xi1>
    %142 = vector.broadcast %cst_23 : f32 to vector<8x32xf32>
    %143 = arith.select %141, %139, %142 : vector<8x32xi1>, vector<8x32xf32>
    %144 = arith.addf %124, %143 : vector<8x32xf32>
    %c7_i32 = arith.constant 7 : i32
    %145 = vector.broadcast %c7_i32 : i32 to vector<1x8xi32>
    %146 = arith.cmpi eq, %3, %145 : vector<1x8xi32>
    %c0_i32_24 = arith.constant 0 : i32
    %147 = vector.shape_cast %146 : vector<1x8xi1> to vector<1x8xi1>
    %148 = vector.broadcast %147 : vector<1x8xi1> to vector<8x8xi1>
    %149 = vector.broadcast %c0_i32_24 : i32 to vector<8x8xi32>
    %150 = arith.select %148, %0, %149 : vector<8x8xi1>, vector<8x8xi32>
    %cst_25 = arith.constant dense<0> : vector<8xi32>
    %151 = vector.multi_reduction <add>, %150, %cst_25 [1] : vector<8x8xi32> to vector<8xi32>
    %152 = vector.shape_cast %151 : vector<8xi32> to vector<8x1xi32>
    %153 = vector.broadcast %c7_i32 : i32 to vector<8x1xi32>
    %154 = arith.cmpi sgt, %1, %153 : vector<8x1xi32>
    %155 = vector.broadcast %152 : vector<8x1xi32> to vector<8x32xi32>
    %156 = vector.broadcast %2 : vector<1x32xi32> to vector<8x32xi32>
    %157 = arith.cmpi eq, %155, %156 : vector<8x32xi32>
    %158 = arith.extui %157 : vector<8x32xi1> to vector<8x32xi32>
    %159 = arith.sitofp %158 : vector<8x32xi32> to vector<8x32xf32>
    %cst_26 = arith.constant 0.000000e+00 : f32
    %160 = vector.shape_cast %154 : vector<8x1xi1> to vector<8x1xi1>
    %161 = vector.broadcast %160 : vector<8x1xi1> to vector<8x32xi1>
    %162 = vector.broadcast %cst_26 : f32 to vector<8x32xf32>
    %163 = arith.select %161, %159, %162 : vector<8x32xi1>, vector<8x32xf32>
    %164 = arith.addf %144, %163 : vector<8x32xf32>
    %c8_i32 = arith.constant 8 : i32
    %165 = arith.truncf %164 : vector<8x32xf32> to vector<8x32xbf16>
    %c0_27 = arith.constant 0 : index
    %c0_28 = arith.constant 0 : index
    %166 = vector.load %arg3[%c0_27, %c0_28] : memref<32x128xbf16, #tpu.memory_space<vmem>>, vector<32x128xbf16>
    %cst_29 = arith.constant dense<0.000000e+00> : vector<8x128xf32>
    %167 = tpu.matmul %165, %166, %cst_29 {dimension_numbers = #tpu.dot_dimension_numbers<[1], [0], [0], [1], [0, 0, 1, 1], [], []>} : vector<8x32xbf16>, vector<32x128xbf16>, vector<8x128xf32> -> vector<8x128xf32>
    %c1_i32_30 = arith.constant 1 : i32
    %168 = vector.broadcast %c1_i32_30 : i32 to vector<8x1xi32>
    %169 = arith.maxsi %1, %168 : vector<8x1xi32>
    %170 = arith.sitofp %169 : vector<8x1xi32> to vector<8x1xf32>
    %171 = tpu.reciprocal %170 {approx = true} : vector<8x1xf32> -> vector<8x1xf32>
    %172 = vector.broadcast %171 : vector<8x1xf32> to vector<8x128xf32>
    %173 = arith.mulf %167, %172 : vector<8x128xf32>
    %c0_31 = arith.constant 0 : index
    %c0_32 = arith.constant 0 : index
    %174 = vector.load %arg4[%c0_31, %c0_32] : memref<8x128xf32, #tpu.memory_space<vmem>>, vector<8x128xf32>
    tpu.vector_store %arg4[%c0_31, %c0_32], %173 {strides = array<i32>} : memref<8x128xf32, #tpu.memory_space<vmem>>, vector<8x128xf32>,
    return
  }
  func.func @transform_0(%arg0: i32) -> (i32, i32) {
    %c0_i32 = arith.constant 0 : i32
    %c0_i32_0 = arith.constant 0 : i32
    return %arg0, %c0_i32 : i32, i32
  }
  func.func @transform_1(%arg0: i32) -> (i32, i32) {
    %c0_i32 = arith.constant 0 : i32
    %c0_i32_0 = arith.constant 0 : i32
    return %arg0, %c0_i32 : i32, i32
  }
  func.func @transform_2(%arg0: i32) -> (i32, i32) {
    %c0_i32 = arith.constant 0 : i32
    %c0_i32_0 = arith.constant 0 : i32
    %c0_i32_1 = arith.constant 0 : i32
    return %c0_i32, %c0_i32_0 : i32, i32
  }
  func.func @transform_3(%arg0: i32) -> (i32, i32) {
    %c0_i32 = arith.constant 0 : i32
    %c0_i32_0 = arith.constant 0 : i32
    return %arg0, %c0_i32 : i32, i32
  }
}

</mosaic_0001>

<bundles_post_ra>
// kernel: tpu_custom_call.1
= control target key start
LH: loop header
LB: loop body
LE: loop exit
PB: predicated region body
PF: predicated region fallthrough
CT: control target
= control target key end

     0   :  { %8 = vsyncpa [#allocation3], 0  ;;  %s908_s0 = inlined_call_operand.vmem [shape: s32[16,8], index: 0, kind: input, shape index: {}]   ;;  %s909_s1 = inlined_call_operand.vmem [shape: s32[16,1], index: 1, kind: input, shape index: {}]   ;;  %s910_s2 = inlined_call_operand.vmem [shape: bf16[32,128], index: 2, kind: input, shape index: {}]   ;;  %s911_s3 = inlined_call_operand.hbm [shape: f32[16,128], index: 3, kind: output, shape index: {}]  }
   0x1   :  { %10 = vsyncpa [#allocation3 + $0x1], 0  ;;  %s737_s12 = smov 0   ;;  %s739_s13 = smov 0  }
   0x2   :  { %s741_s14 = smov 0   ;;  %s743_s15 = smov 0  }
   0x3 LB: > { %s758_s16 = sadd.s32 4294967295, %s711_s15   ;;  %s570_s17 = sadd.s32 4294967294, %s711_s15   ;;  %s711_s15 = sphi %s743_s15, %s917_s15   ;;  %s707_s14 = sphi %s741_s14, %s916_s14   ;;  %s703_s13 = sphi %s739_s13, %s915_s13   ;;  %s699_s12 = sphi %s737_s12, %s914_s12  }
   0x4   : > { %s762_s18 = sadd.s32 1, %s711_s15   ;;  %s96_s19 = sadd.s32 1, %s707_s14 }
   0x5   : > { %s93_s20 = ssub.s32 %s711_s15, %s762_s18  ;;  %p106_p0 = scmp.ne.s32.totalorder %s707_s14, %s703_s13 }
   0x6   : > { %p94_p1 = scmp.eq.s32.totalorder %s93_s20, 0  ;;  %p107_p2 = scmp.eq.s32.totalorder %s758_s16, 1 }
   0x7   : > { %p112_p3 = scmp.ne.s32.totalorder %s703_s13, %s699_s12  ;;  %p113_p4 = scmp.eq.s32.totalorder %s570_s17, 1 }
   0x8   : > { %s773_s21 = scalar_select %p94_p1, %s707_s14, %s96_s19  }
   0x9   : > { %p775_p5 = por %p107_p2, %p106_p0  ;;  %p779_p6 = por %p113_p4, %p112_p3 }
   0xa   : > { %p573_p7 = scmp.ge.s32.totalorder %s711_s15, 1  ;;  %p148_p8 = scmp.lt.s32.totalorder %s711_s15, 3 }
   0xc   : > { %p149_p9 = pnand %p573_p7, %p148_p8 }
   0xd   : > { %p175_p10 = scmp.lt.s32.totalorder (!%p149_p9), %s758_s16, 1  ;;  %s172_s9 = sand.u32 (!%p149_p9), 1, %s703_s13  }
   0xe   : > { %152 = sbr.rel (%p149_p9) target bundleno = 447 (0x1bf), region = 32  ;;  %s574_s10 = sshll.u32 (!%p149_p9), %s172_s9, 3 }
   0xf   : > { %s589_s11 = sshll.u32 (!%p149_p9), %s758_s16, 7  ;;  %s174_s17 = scalar_lea.vmem (!%p149_p9), [#allocation2], %s574_s10 }
  0x10   : > { %s499_s19 = sshll.u32 (!%p149_p9), %s174_s17, 4  ;;  %s486_s26 = scalar_lea.sflag (!%p149_p9), [#allocation3], %s172_s9  ;;  %s869_s19 = int_to_ptr.vmem [resolvable:$true] %s499_s19 }
  0x11   : > { %s716_s27 = smov (!%p149_p9), [#allocation2]  }
  0x13   : > { %v186_v0 = vlaneseq  ;;  %v713_v1 = vmov 0   ;;  %s789_s24 = scalar_select %p175_p10, %s758_s16, 1  ;;  %vm192_vm4 = vcmask 64512   ;;  %v714_v42 = vmov 0.0  }
  0x14   : > { %646 = vset.pattern.permute.xlu1 %v713_v1  ;;  %645 = vset.pattern.permute.xlu0 %v713_v1  ;;  %s651_s16 = scalar_lea.vmem %s869_s19, 128 }
  0x15   : > { %v791_v2 = vand.u32 127, %v186_v0  ;;  %s575_s25 = sshll.u32 %s789_s24, 3  ;;  %595 = vmatprep.subr.bf16.mxu0 %v714_v42  ;;  %p652_p11 = scmp.ne.s32.totalorder %s869_s19, %s651_s16 }
  0x16   : > { %s178_s28 = scalar_lea.vmem %s908_s0, %s575_s25  ;;  %s182_s4 = scalar_lea.vmem %s909_s1, %s575_s25 }
  0x17   : > { %vm217_vm0 = vcmp.eq.s32.totalorder %v791_v2, 1  ;;  %vm188_vm1 = vcmp.eq.s32.totalorder %v791_v2, 0  ;;  %vm357_vm2 = vcmp.eq.s32.totalorder %v791_v2, 6  ;;  %vm385_vm3 = vcmp.eq.s32.totalorder %v791_v2, 7  ;;  %v184_v3 = vld [vmem:[%s178_s28] sm:$0xff]  ;;  %s867_s25 = scalar_lea.hbm %s911_s3, %s589_s11  ;;  %p653_p12 = pnand %p652_p11, %p775_p5 }
  0x18   : > { %v220_v4 = vsel %vm217_vm0, %v184_v3, 0  ;;  %v191_v5 = vsel %vm188_vm1, %v184_v3, 0  ;;  %v360_v6 = vsel %vm357_vm2, %v184_v3, 0  ;;  %v388_v7 = vsel %vm385_vm3, %v184_v3, 0  ;;  %v185_v39 = vld [vmem:[%s182_s4] sm:$0xff]  ;;  %s655_s28 = sshll.u32 %s716_s27, 4  ;;  %s656_s28 = int_to_ptr.vmem [resolvable:$false] %s655_s28 }
  0x19   : > { %v221_v8 = vsel %vm192_vm4, %v220_v4, 0  ;;  %v193_v9 = vsel %vm192_vm4, %v191_v5, 0  ;;  %v806_v10 = vsel %vm192_vm4, %v360_v6, 0  ;;  %vm245_vm5 = vcmp.eq.s32.totalorder %v791_v2, 2  ;;  %v648_v4 = vld [vmem:[%s910_s2] sm:$0xff]   ;;  %p654_p13 = pneg %p653_p12  ;;  %s657_s29 = scalar_lea.vmem %s656_s28, 256 }
  0x1a   : > { %v223_v11 = vshrl.u32 %v221_v8, 16  ;;  %v194_v12 = vand.u32 65535, %v193_v9  ;;  %v363_v13 = vshrl.u32 %v806_v10, 16  ;;  %v195_v14 = vshrl.u32 %v193_v9, 16  ;;  %p658_p0 = scmp.lt.s32.totalorder %s869_s19, %s656_s28  ;;  %p659_p1 = scmp.lt.s32.totalorder %s657_s29, %s651_s16 }
  0x1b   : > { %v389_v15 = vsel %vm192_vm4, %v388_v7, 0  ;;  %v248_v18 = vsel %vm245_vm5, %v184_v3, 0  ;;  %v222_v22 = vand.u32 65535, %v221_v8  ;;  %vm273_vm6 = vcmp.eq.s32.totalorder %v791_v2, 3 }
  0x1c   : > { %v225_v16 = vcvt.s32.f32 %v223_v11  ;;  %v196_v17 = vcvt.s32.f32 %v194_v12  ;;  %v365_v19 = vcvt.s32.f32 %v363_v13  ;;  %v197_v20 = vcvt.s32.f32 %v195_v14  ;;  %p660_p2 = por %p659_p1, %p658_p0 }
  0x1d   : > { %v391_v21 = vshrl.u32 %v389_v15, 16  ;;  %v249_v23 = vsel %vm192_vm4, %v248_v18, 0  ;;  %v224_v25 = vcvt.s32.f32 %v222_v22  ;;  %v390_v26 = vand.u32 65535, %v389_v15 }
  0x1e   : > { %228 = vadd.xlane.f32.xlu1 %v225_v16  ;;  %198 = vadd.xlane.f32.xlu0 %v196_v17  ;;  %v251_v27 = vshrl.u32 %v249_v23, 16  ;;  %v276_v28 = vsel %vm273_vm6, %v184_v3, 0  ;;  %v250_v31 = vand.u32 65535, %v249_v23  ;;  %vm301_vm7 = vcmp.eq.s32.totalorder %v791_v2, 4  ;;  %p661_p3 = pnand %p660_p2, %p654_p13 }
  0x1f   : > { %v393_v24 = vcvt.s32.f32 %v391_v21  ;;  %v392_v29 = vcvt.s32.f32 %v390_v26  ;;  %v277_v32 = vsel %vm192_vm4, %v276_v28, 0  ;;  %v304_v35 = vsel %vm301_vm7, %v184_v3, 0 }
  0x20   : > { %v253_v30 = vcvt.s32.f32 %v251_v27  ;;  %v252_v33 = vcvt.s32.f32 %v250_v31  ;;  %v279_v34 = vshrl.u32 %v277_v32, 16  ;;  %v278_v37 = vand.u32 65535, %v277_v32 }
  0x21   : > { %v305_v38 = vsel %vm192_vm4, %v304_v35, 0  ;;  %vm329_vm8 = vcmp.eq.s32.totalorder %v791_v2, 5  ;;  %vm206_vm9 = vcmp.gt.s32.totalorder %v185_v39, 0  ;;  %vm262_vm10 = vcmp.gt.s32.totalorder %v185_v39, 2 }
  0x22   : > { %368 = vadd.xlane.f32.xlu1 %v365_v19  ;;  %200 = vadd.xlane.f32.xlu0 %v197_v20  ;;  %v281_v36 = vcvt.s32.f32 %v279_v34  ;;  %v280_v40 = vcvt.s32.f32 %v278_v37  ;;  %v307_v41 = vshrl.u32 %v305_v38, 16  ;;  %v332_v43 = vsel %vm329_vm8, %v184_v3, 0  ;;  %v647_v3 = vld [vmem:[%s910_s2 + $0x8] sm:$0xff]  }
  0x23   : > { %v306_v45 = vand.u32 65535, %v305_v38  ;;  %v333_v46 = vsel %vm192_vm4, %v332_v43, 0  ;;  %v210_v47 = vsel %vm206_vm9, 1, %v713_v1  ;;  %v266_v50 = vsel %vm262_vm10, 1, %v713_v1  ;;  %596 = vmatpush3.bf16.msra.mxu0 %v647_v3 }
  0x24   : > { %v309_v44 = vcvt.s32.f32 %v307_v41  ;;  %v335_v49 = vshrl.u32 %v333_v46, 16  ;;  %vm290_vm11 = vcmp.gt.s32.totalorder %v185_v39, 3  ;;  %vm234_vm12 = vcmp.gt.s32.totalorder %v185_v39, 1  ;;  %597 = vmatprep.subr.bf16.mxu0 %v714_v42 }
  0x25   : > { %v308_v48 = vcvt.s32.f32 %v306_v45  ;;  %v334_v52 = vand.u32 65535, %v333_v46  ;;  %v294_v53 = vsel %vm290_vm11, 1, %v713_v1  ;;  %v475_v54 = vsel %vm234_vm12, %v185_v39, 1 }
  0x26   : > { %396 = vadd.xlane.f32.xlu1 %v393_v24  ;;  %226 = vadd.xlane.f32.xlu0 %v224_v25  ;;  %v337_v51 = vcvt.s32.f32 %v335_v49  ;;  %vm318_vm13 = vcmp.gt.s32.totalorder %v185_v39, 4  ;;  %v362_v56 = vand.u32 65535, %v806_v10  ;;  %v476_v57 = vcvt.s32.f32 %v475_v54 }
  0x27   : > { %v336_v55 = vcvt.s32.f32 %v334_v52  ;;  %v322_v58 = vsel %vm318_vm13, 1, %v713_v1  ;;  %vm346_vm14 = vcmp.gt.s32.totalorder %v185_v39, 5  ;;  %vm374_vm15 = vcmp.gt.s32.totalorder %v185_v39, 6  ;;  %598 = vmatpush3.bf16.msra.mxu0 %v648_v4 }
  0x28   : > { %v364_v59 = vcvt.s32.f32 %v362_v56  ;;  %649 = vrcp.f32 %v476_v57  ;;  %v350_v60 = vsel %vm346_vm14, 1, %v713_v1  ;;  %v378_v61 = vsel %vm374_vm15, 1, %v713_v1 }
  0x29   : > { %vm402_vm0 = vcmp.gt.s32.totalorder %v185_v39, 7  ;;  %v238_v0 = vsel %vm234_vm12, 1, %v713_v1  ;;  %vm715_vm1 = vmmov 0  }
  0x2a   : > { %394 = vadd.xlane.f32.xlu1 %v392_v29  ;;  %256 = vadd.xlane.f32.xlu0 %v253_v30  ;;  %v406_v62 = vsel %vm402_vm0, 1, %v713_v1 }
  0x2b   : > { %599 = vmatprep.mubr.msk.bf16.mxu0 %vm715_vm1, %v714_v42 }
  0x2e   : > { %254 = vadd.xlane.f32.xlu0 %v252_v33 }
  0x32   : > { %284 = vadd.xlane.f32.xlu0 %v281_v36 }
  0x35   : > { %v650_v63 = vpop.eup %649 }
  0x36   : > { %282 = vadd.xlane.f32.xlu0 %v280_v40 }
  0x3a   : > { %312 = vadd.xlane.f32.xlu0 %v309_v44 }
  0x3b   : > { %212 = vperm.xlu1 %646, %v210_v47  }
  0x3e   : > { %310 = vadd.xlane.f32.xlu0 %v308_v48 }
  0x3f   : > { %268 = vperm.xlu1 %646, %v266_v50  }
  0x42   : > { %340 = vadd.xlane.f32.xlu0 %v337_v51 }
  0x43   : > { %296 = vperm.xlu1 %646, %v294_v53  }
  0x46   : > { %338 = vadd.xlane.f32.xlu0 %v336_v55 }
  0x47   : > { %324 = vperm.xlu1 %646, %v322_v58  }
  0x4a   : > { %366 = vadd.xlane.f32.xlu0 %v364_v59 }
  0x4b   : > { %352 = vperm.xlu1 %646, %v350_v60  }
  0x4f   : > { %380 = vperm.xlu1 %646, %v378_v61  }
  0x53   : > { %408 = vperm.xlu1 %646, %v406_v62  }
  0x57   : > { %480 = vperm.xlu1 %646, %v650_v63  }
  0x60   : > { %240 = vperm.xlu0 %645, %v238_v0  }
  0xa7   : > { %v229_v5 = vpop.xlane.xlu1 %228  ;;  %v199_v6 = vpop.xlane.xlu0 %198 }
  0xa8   : > { %v231_v21 = vcvt.f32.s32 %v229_v5  ;;  %v202_v31 = vcvt.f32.s32 %v199_v6 }
  0xaa   : > { %v232_v24 = vshll.u32 %v231_v21, 16 }
  0xab   : > { %v201_v7 = vpop.xlane.xlu0 %200  ;;  %v369_v1 = vpop.xlane.xlu1 %368 }
  0xac   : > { %v203_v22 = vcvt.f32.s32 %v201_v7  ;;  %v371_v41 = vcvt.f32.s32 %v369_v1 }
  0xae   : > { %v204_v25 = vshll.u32 %v203_v22, 16  ;;  %v372_v52 = vshll.u32 %v371_v41, 16 }
  0xaf   : > { %v227_v8 = vpop.xlane.xlu0 %226  ;;  %v397_v9 = vpop.xlane.xlu1 %396 }
  0xb0   : > { %v230_v26 = vcvt.f32.s32 %v227_v8  ;;  %v205_v35 = vadd.s32 %v204_v25, %v202_v31  ;;  %v399_v43 = vcvt.f32.s32 %v397_v9 }
  0xb2   : > { %v233_v36 = vadd.s32 %v232_v24, %v230_v26  ;;  %vm207_vm2 = vcmp.eq.s32.totalorder %v205_v35, %v791_v2  ;;  %v400_v53 = vshll.u32 %v399_v43, 16 }
  0xb3   : > { %v257_v10 = vpop.xlane.xlu0 %256  ;;  %v843_v12 = vpop.xlane.xlu1 %394  ;;  %v577_v55 = vsel %vm207_vm2, 1.0, %v714_v42  ;;  %vm430_vm2 = vcmask 261120  }
  0xb4   : > { %v259_v23 = vcvt.f32.s32 %v257_v10  ;;  %vm235_vm3 = vcmp.eq.s32.totalorder %v233_v36, %v791_v2  ;;  %v398_v54 = vcvt.f32.s32 %v843_v12 }
  0xb5   : > { %v578_v59 = vsel %vm235_vm3, 1.0, %v714_v42 }
  0xb6   : > { %v260_v32 = vshll.u32 %v259_v23, 16  ;;  %v401_v4 = vadd.s32 %v400_v53, %v398_v54 }
  0xb7   : > { %v255_v11 = vpop.xlane.xlu0 %254  ;;  %v213_v14 = vpop.permute.xlu1 %212 }
  0xb8   : > { %v258_v28 = vcvt.f32.s32 %v255_v11  ;;  %vm214_vm5 = vcmp.eq.s32.totalorder %v213_v14, 1  ;;  %vm403_vm14 = vcmp.eq.s32.totalorder %v401_v4, %v791_v2 }
  0xb9   : > { %v215_v60 = vsel %vm214_vm5, %v577_v55, 0.0 }
  0xba   : > { %v261_v37 = vadd.s32 %v260_v32, %v258_v28 }
  0xbb   : > { %v285_v13 = vpop.xlane.xlu0 %284  ;;  %v269_v17 = vpop.permute.xlu1 %268 }
  0xbc   : > { %v287_v29 = vcvt.f32.s32 %v285_v13  ;;  %vm263_vm4 = vcmp.eq.s32.totalorder %v261_v37, %v791_v2  ;;  %vm270_vm7 = vcmp.eq.s32.totalorder %v269_v17, 1 }
  0xbd   : > { %v579_v58 = vsel %vm263_vm4, 1.0, %v714_v42 }
  0xbe   : > { %v288_v38 = vshll.u32 %v287_v29, 16  ;;  %v271_v5 = vsel %vm270_vm7, %v579_v58, 0.0 }
  0xbf   : > { %v283_v15 = vpop.xlane.xlu0 %282  ;;  %v297_v19 = vpop.permute.xlu1 %296 }
  0xc0   : > { %v286_v33 = vcvt.f32.s32 %v283_v15  ;;  %vm298_vm10 = vcmp.eq.s32.totalorder %v297_v19, 1  ;;  %v584_v15 = vsel %vm403_vm14, 1.0, %v714_v42 }
  0xc2   : > { %v289_v45 = vadd.s32 %v288_v38, %v286_v33 }
  0xc3   : > { %v313_v16 = vpop.xlane.xlu0 %312  ;;  %v325_v30 = vpop.permute.xlu1 %324 }
  0xc4   : > { %v315_v34 = vcvt.f32.s32 %v313_v16  ;;  %vm291_vm6 = vcmp.eq.s32.totalorder %v289_v45, %v791_v2  ;;  %vm326_vm12 = vcmp.eq.s32.totalorder %v325_v30, 1 }
  0xc5   : > { %v580_v0 = vsel %vm291_vm6, 1.0, %v714_v42 }
  0xc6   : > { %v316_v46 = vshll.u32 %v315_v34, 16  ;;  %v299_v1 = vsel %vm298_vm10, %v580_v0, 0.0 }
  0xc7   : > { %v311_v18 = vpop.xlane.xlu0 %310  ;;  %v353_v47 = vpop.permute.xlu1 %352 }
  0xc8   : > { %v314_v39 = vcvt.f32.s32 %v311_v18  ;;  %vm354_vm15 = vcmp.eq.s32.totalorder %v353_v47, 1 }
  0xca   : > { %v317_v49 = vadd.s32 %v316_v46, %v314_v39 }
  0xcb   : > { %v341_v20 = vpop.xlane.xlu0 %340  ;;  %v381_v61 = vpop.permute.xlu1 %380 }
  0xcc   : > { %v343_v40 = vcvt.f32.s32 %v341_v20  ;;  %vm319_vm9 = vcmp.eq.s32.totalorder %v317_v49, %v791_v2  ;;  %vm382_vm0 = vcmp.eq.s32.totalorder %v381_v61, 1 }
  0xcd   : > { %v581_v6 = vsel %vm319_vm9, 1.0, %v714_v42 }
  0xce   : > { %v344_v50 = vshll.u32 %v343_v40, 16  ;;  %v327_v10 = vsel %vm326_vm12, %v581_v6, 0.0 }
  0xcf   : > { %v339_v27 = vpop.xlane.xlu0 %338  ;;  %v409_v11 = vpop.permute.xlu1 %408 }
  0xd0   : > { %v342_v48 = vcvt.f32.s32 %v339_v27  ;;  %vm410_vm1 = vcmp.eq.s32.totalorder %v409_v11, 1 }
  0xd1   : > { %v411_v19 = vsel %vm410_vm1, %v584_v15, 0.0 }
  0xd2   : > { %v345_v56 = vadd.s32 %v344_v50, %v342_v48 }
  0xd3   : > { %v367_v44 = vpop.xlane.xlu0 %366 }
  0xd4   : > { %v370_v51 = vcvt.f32.s32 %v367_v44  ;;  %vm347_vm11 = vcmp.eq.s32.totalorder %v345_v56, %v791_v2 }
  0xd5   : > { %v582_v8 = vsel %vm347_vm11, 1.0, %v714_v42 }
  0xd6   : > { %v373_v62 = vadd.s32 %v372_v52, %v370_v51  ;;  %v355_v14 = vsel %vm354_vm15, %v582_v8, 0.0 }
  0xd8   : > { %vm375_vm13 = vcmp.eq.s32.totalorder %v373_v62, %v791_v2  ;;  %v481_v2 = vpop.permute.xlu1 %480 }
  0xd9   : > { %v583_v12 = vsel %vm375_vm13, 1.0, %v714_v42 }
  0xda   : > { %v383_v17 = vsel %vm382_vm0, %v583_v12, 0.0 }
  0xdb   : > { %v241_v57 = vpop.permute.xlu0 %240 }
  0xdc   : > { %vm242_vm8 = vcmp.eq.s32.totalorder %v241_v57, 1 }
  0xdd   : > { %v243_v63 = vsel %vm242_vm8, %v578_v59, 0.0 }
  0xde   : > { %v244_v3 = vadd.f32 %v243_v63, %v215_v60 }
  0xe0   : > { %v272_v7 = vadd.f32 %v271_v5, %v244_v3 }
  0xe2   : > { %v300_v9 = vadd.f32 %v299_v1, %v272_v7 }
  0xe4   : > { %v328_v13 = vadd.f32 %v327_v10, %v300_v9 }
  0xe6   : > { %v356_v16 = vadd.f32 %v355_v14, %v328_v13 }
  0xe8   : > { %v384_v18 = vadd.f32 %v383_v17, %v356_v16 }
  0xea   : > { %v412_v20 = vadd.f32 %v411_v19, %v384_v18 }
  0xec   : > { %v413_v21 = vpack.c.bf16 %v412_v20, %v412_v20 }
  0xee   : > { %600 = vmatmul.mubr.msk.bf16.vlgmr.msra.gmra.mxu0 %vm430_vm2, %v413_v21 }
 0x1ae   : > { %v468_v22 = vpop.f32.mrf.mxu0 }
 0x1af   : > { %v483_v23 = vmul.f32 %v481_v2, %v468_v22 }
 0x1b0   : > { %v601_v42 = vpop.f32.mrf.mxu0 }
 0x1b1   : > { %484 = vst [vmem:[%s174_s17] sm:$0xff] %v483_v23 }
 0x1b2   : > { %v471_v24 = vpop.f32.mrf.mxu0 }
 0x1b3   : > { %664 = shalt.err (!%p661_p3)
}
 0x1b4   : > { %s665_s30 = scalar_lea.hbm %s867_s25, 128  ;;  %s669_s6 = scalar_lea.hbm %s911_s3, 256 }
 0x1b5   : > { %p666_p4 = scmp.ne.s32.totalorder %s867_s25, %s665_s30  ;;  %p670_p9 = scmp.lt.s32.totalorder %s867_s25, %s911_s3 }
 0x1b6   : > { %p671_p10 = scmp.lt.s32.totalorder %s669_s6, %s665_s30 }
 0x1b7   : > { %p667_p7 = pnand %p666_p4, %p775_p5 }
 0x1b8   : > { %p672_p11 = por %p671_p10, %p670_p9 }
 0x1b9   : > { %p668_p8 = pneg %p667_p7 }
 0x1bb   : > { %p673_p12 = pnand %p672_p11, %p668_p8 }
 0x1bd   : > { %676 = shalt.err (!%p673_p12)
}
 0x1be   : > { %603 = dma.vmem_to_hbm [thread:$0]  (%p775_p5), %s869_s19, 128, %s867_s25, %s486_s26   ;;  %v602_v25 = vpop.f32.mrf.mxu0 }
 0x1bf PF: > { %p609_p13 = scmp.ge.s32.totalorder %s711_s15, 2  ;;  %s511_s9 = sand.u32 1, %s699_s12  }
 0x1c0   : > { %s512_s10 = scalar_lea.sflag [#allocation3], %s511_s9 }
 0x1c1   : > { %p606_p0 = pnand %p609_p13, %p779_p6 }
 0x1c3   : > { %p607_p1 = pneg %p606_p0 }
 0x1c5   : > { %694 = dma.done.wait (%p607_p1), %s512_s10, 128  }
 0x1c6   : > { %696 = vsyncadd (%p607_p1), %s512_s10, 4294967168  ;;  %p13_p2 = scmp.ge.s32.totalorder %s762_s18, 4   ;;  %s914_s12 = smov %s703_s13 }
 0x1c7   : > { %s915_s13 = smov %s707_s14  ;;  %s916_s14 = smov %s773_s21 }
 0x1c8   : > { %s917_s15 = smov %s762_s18  ;;  %15 = sbr.rel (!%p13_p2) target bundleno = 3 (0x3), region = 70 }
 0x1cd   :  { %517 = vsyncpa [#allocation3], 1 }
 0x1ce   :  { %519 = vsyncpa [#allocation3 + $0x1], 1 }

</bundles_post_ra>
